<compile_context>
chip_gen: v7x
topology: tpu7x:2x2x1
jax: 0.10.0
libtpu: 0.0.40
codegen_flags: <defaults>
</compile_context>

<pallas_src>
import functools

import jax
import jax.numpy as jnp
import numpy as np
from jax import lax
from jax.experimental import pallas as pl
from jax.experimental.pallas import tpu as pltpu

_LANES = 128
_SUBLANES = 8
_ALIGN_ELEMS = _SUBLANES * _LANES        # 1024
_MAX_BLOCK_ROWS = 4096                   # 4096 x 128 f32 = 2 MiB per input per block
_MAX_CHUNK_ROWS = 512                    # compute sub-chunk: 512 x 128 f32 = 256 KiB temps
_VMEM_LIMIT_BYTES = 32 * 1024 * 1024     # explicit scoped-VMEM budget, safe v5e..v7x


def _num_grid_shards():
    """Best-effort TensorCore count behind one JAX device.

    v4 / v5p / v7x expose 2 TensorCores per device; a leading "parallel" grid
    axis of size 2 lets each core stream half the data. v5e / v6e have a
    single TC, where the extra shard axis is just a sequential loop plus a
    possible masked duplicate block -- skip it there.
    """
    try:
        kind = (jax.devices()[0].device_kind or "").lower()
    except Exception:
        return 2
    single_tc_markers = ("v5e", "v5 lite", "v5litepod", "v6e", "v6 lite", "v2", "v3")
    if any(m in kind for m in single_tc_markers):
        return 1
    return 2


def _dice_bce_kernel(p_ref, t_ref, out_ref,
                     acc_pt, acc_ppt, acc_bce,
                     *, rows, block_rows, chunk_rows, steps_per_shard,
                     needs_mask):
    c = pl.program_id(0)   # "parallel" shard axis (megacore split on 2-TC chips)
    s = pl.program_id(1)   # "arbitrary" streaming / reduction axis

    @pl.when(s == 0)
    def _init():
        acc_pt[...] = jnp.zeros_like(acc_pt)
        acc_ppt[...] = jnp.zeros_like(acc_ppt)
        acc_bce[...] = jnp.zeros_like(acc_bce)

    num_chunks = block_rows // chunk_rows
    base_row = (c * steps_per_shard + s) * block_rows

    def vreg_sum(x):
        # (chunk_rows, 128) -> (8, 128): pure vreg adds on the VPU.
        return jnp.sum(x.reshape(-1, _SUBLANES, _LANES), axis=0)

    def process_chunk(ci, masked):
        start = ci * chunk_rows
        if not isinstance(start, int):
            start = pl.multiple_of(start, chunk_rows)
        # Upcast in-register; inputs are streamed from HBM in their native dtype.
        p = p_ref[pl.ds(start, chunk_rows), :].astype(jnp.float32)
        t = t_ref[pl.ds(start, chunk_rows), :].astype(jnp.float32)
        if masked:
            # Zero rows past the real data (ragged last block, or a clamped
            # duplicate block on an uneven shard split). Zeroing the *inputs*
            # keeps every partial sum exact (BCE term is 0 thanks to the -100
            # log clamp) and never lets unfetched garbage reach the log.
            row_ids = (base_row + start
                       + lax.broadcasted_iota(jnp.int32, (chunk_rows, _LANES), 0))
            valid = row_ids < rows
            p = jnp.where(valid, p, 0.0)
            t = jnp.where(valid, t, 0.0)
        # PyTorch's F.binary_cross_entropy clamps log terms at -100.
        log_p = jnp.maximum(jnp.log(p), -100.0)
        log_1mp = jnp.maximum(jnp.log(1.0 - p), -100.0)
        # bce = -(t*log_p + (1-t)*log_1mp) = -(t*(log_p - log_1mp) + log_1mp):
        # accumulate the positive form, negate once at finalize.
        bce_pos = t * (log_p - log_1mp) + log_1mp
        acc_pt[...] += vreg_sum(p * t)
        acc_ppt[...] += vreg_sum(p + t)
        acc_bce[...] += vreg_sum(bce_pos)

    def accumulate(masked):
        if num_chunks == 1:
            process_chunk(0, masked)
            return

        def body(ci, carry):
            process_chunk(ci, masked)
            return carry

        # Unroll the hot (unmasked) path for scheduler visibility; keep the
        # cold masked edge-block path rolled to bound code size.
        unroll = (not masked) and num_chunks <= 8
        lax.fori_loop(0, num_chunks, body, 0, unroll=unroll)

    if needs_mask:
        # Only the edge block pays the mask; interior blocks run unmasked.
        is_edge = base_row + block_rows > rows

        @pl.when(is_edge)
        def _masked():
            accumulate(masked=True)

        @pl.when(jnp.logical_not(is_edge))
        def _unmasked():
            accumulate(masked=False)
    else:
        accumulate(masked=False)

    @pl.when(s == pl.num_programs(1) - 1)
    def _finalize():
        # Single cross-lane reduction per shard.
        out_ref[0, 0] = jnp.sum(acc_pt[...])
        out_ref[0, 1] = jnp.sum(acc_ppt[...])
        out_ref[0, 2] = -jnp.sum(acc_bce[...])


def dice_bce_loss(inputs, targets, smooth=1.0):
    """Pallas TPU implementation of DiceBCELoss.forward (post-sigmoid inputs)."""
    # TODO(synk): if the caller controls the upstream sigmoid, accept logits and
    # fuse sigmoid/softplus here to cut a full HBM read+write pass (the module's
    # contract is post-sigmoid probabilities, so it is not done here).
    n_elem = int(np.prod(inputs.shape))
    p = jnp.reshape(inputs, (-1,))
    t = jnp.reshape(targets, (-1,))

    # Common path (typical NCHW segmentation shapes): n_elem % 1024 == 0, so the
    # 2-D reshape below is free. Rare unaligned sizes fall back to a zero-pad;
    # padded p = t = 0 contributes exactly 0 to every partial sum (BCE via the
    # -100 log clamp), and BCE divides by the TRUE element count.
    rem = n_elem % _ALIGN_ELEMS
    if rem:
        pad = _ALIGN_ELEMS - rem
        p = jnp.pad(p, (0, pad))
        t = jnp.pad(t, (0, pad))

    rows = p.shape[0] // _LANES                       # always a multiple of 8
    p2 = p.reshape(rows, _LANES)                      # native dtype pass-through
    t2 = t.reshape(rows, _LANES)

    block_rows = min(_MAX_BLOCK_ROWS, rows)
    # Compute sub-chunk: largest divisor of the block <= _MAX_CHUNK_ROWS so
    # Mosaic's element-wise temporaries stay small.
    chunk_rows = block_rows
    for cand in (512, 256, 128, 64, 32, 16, 8):
        if cand <= _MAX_CHUNK_ROWS and block_rows % cand == 0:
            chunk_rows = cand
            break

    total_blocks = pl.cdiv(rows, block_rows)
    num_shards = min(_num_grid_shards(), total_blocks)
    steps_per_shard = pl.cdiv(total_blocks, num_shards)
    needs_mask = (rows % block_rows != 0) or (num_shards * steps_per_shard != total_blocks)

    def in_idx(c, s):
        # Clamp so an uneven shard split never indexes past the last block; the
        # duplicated block's contribution is masked to zero in-kernel.
        b = jnp.minimum(c * steps_per_shard + s, total_blocks - 1)
        return (b, 0)

    kernel = functools.partial(
        _dice_bce_kernel,
        rows=rows,
        block_rows=block_rows,
        chunk_rows=chunk_rows,
        steps_per_shard=steps_per_shard,
        needs_mask=needs_mask,
    )

    partials = pl.pallas_call(
        kernel,
        out_shape=jax.ShapeDtypeStruct((num_shards, 3), jnp.float32),
        grid_spec=pltpu.PrefetchScalarGridSpec(
            num_scalar_prefetch=0,
            grid=(num_shards, steps_per_shard),
            in_specs=[
                pl.BlockSpec((block_rows, _LANES), in_idx),
                pl.BlockSpec((block_rows, _LANES), in_idx),
            ],
            out_specs=pl.BlockSpec(
                (1, 3), lambda c, s: (c, 0), memory_space=pltpu.SMEM
            ),
            scratch_shapes=[pltpu.VMEM((_SUBLANES, _LANES), jnp.float32)] * 3,
        ),
        compiler_params=pltpu.CompilerParams(
            dimension_semantics=("parallel", "arbitrary"),
            vmem_limit_bytes=_VMEM_LIMIT_BYTES,
        ),
    )(p2, t2)

    # Combine per-shard partial sums and finalize (tiny, done in JAX).
    sums = jnp.sum(partials, axis=0)
    intersection, sum_p_plus_t, sum_bce = sums[0], sums[1], sums[2]
    dice_loss = 1.0 - (2.0 * intersection + smooth) / (sum_p_plus_t + smooth)
    bce_mean = sum_bce / float(n_elem)
    return bce_mean + dice_loss


def _reference(inputs, targets, smooth=1.0):
    p = jnp.reshape(inputs, (-1,)).astype(jnp.float32)
    t = jnp.reshape(targets, (-1,)).astype(jnp.float32)
    intersection = jnp.sum(p * t)
    dice_loss = 1.0 - (2.0 * intersection + smooth) / (jnp.sum(p) + jnp.sum(t) + smooth)
    log_p = jnp.maximum(jnp.log(p), -100.0)
    log_1mp = jnp.maximum(jnp.log(1.0 - p), -100.0)
    bce = jnp.mean(-(t * log_p + (1.0 - t) * log_1mp))
    return bce + dice_loss


if __name__ == "__main__":
    key = jax.random.PRNGKey(0)

    shapes = [
        (2, 4, 16, 16),    # primary UNet-style NCHW case (single aligned block)
        (2, 3, 15, 17),    # unaligned element count -> zero-pad fallback
        (3, 1, 256, 256),  # single block, multi-chunk in-kernel loop
        (5, 3, 256, 256),  # multiple 4096-row blocks, ragged (masked) edge block
    ]
    for i, shp in enumerate(shapes):
        k_in, k_tg = jax.random.split(jax.random.fold_in(key, i))
        logits = jax.random.normal(k_in, shp, dtype=jnp.float32)
        inputs = jax.nn.sigmoid(logits)   # probabilities in (0,1), post-sigmoid UNet output
        targets = jax.random.bernoulli(k_tg, p=0.5, shape=shp).astype(jnp.float32)

        loss = dice_bce_loss(inputs, targets, smooth=1.0)
        jax.block_until_ready(loss)
        ref = _reference(inputs, targets, smooth=1.0)
        jax.block_until_ready(ref)

        assert np.isclose(np.asarray(loss), np.asarray(ref), rtol=1e-4, atol=1e-5), (
            shp, float(loss), float(ref))

    print("KERNEL_OK")
</pallas_src>

<mosaic_0001>
module attributes {stable_mosaic.version = 11 : i64} {
  func.func @_dice_bce_kernel(%arg0: i32, %arg1: i32, %arg2: memref<16x128xf32, #tpu.memory_space<vmem>>, %arg3: memref<16x128xf32, #tpu.memory_space<vmem>>, %arg4: memref<1x3xf32, #tpu.memory_space<smem>>, %arg5: memref<8x128xf32, #tpu.memory_space<vmem>>, %arg6: memref<8x128xf32, #tpu.memory_space<vmem>>, %arg7: memref<8x128xf32, #tpu.memory_space<vmem>>) attributes {dimension_semantics = [#tpu.dimension_semantics<parallel>, #tpu.dimension_semantics<arbitrary>], iteration_bounds = array<i64: 1, 1>, scalar_prefetch = 0 : i64, scratch_operands = 3 : i64, tpu.core_type = #tpu.core_type<tc>, window_params = [{transform_indices = @transform_0, window_bounds = array<i64: 16, 128>}, {transform_indices = @transform_1, window_bounds = array<i64: 16, 128>}, {transform_indices = @transform_2, window_bounds = array<i64: 1, 3>}]} {
    %c0_i32 = arith.constant 0 : i32
    %0 = arith.cmpi eq, %arg1, %c0_i32 : i32
    %1 = arith.extui %0 : i1 to i32
    %c0_i32_0 = arith.constant 0 : i32
    %2 = arith.cmpi ne, %1, %c0_i32_0 : i32
    scf.if %2 {
      %cst_23 = arith.constant 0.000000e+00 : f32
      %36 = vector.broadcast %cst_23 : f32 to vector<8x128xf32>
      %c0_24 = arith.constant 0 : index
      %c0_25 = arith.constant 0 : index
      %37 = vector.load %arg5[%c0_24, %c0_25] : memref<8x128xf32, #tpu.memory_space<vmem>>, vector<8x128xf32>
      tpu.vector_store %arg5[%c0_24, %c0_25], %36 {strides = array<i32>} : memref<8x128xf32, #tpu.memory_space<vmem>>, vector<8x128xf32>,
      %cst_26 = arith.constant 0.000000e+00 : f32
      %38 = vector.broadcast %cst_26 : f32 to vector<8x128xf32>
      %c0_27 = arith.constant 0 : index
      %c0_28 = arith.constant 0 : index
      %39 = vector.load %arg6[%c0_27, %c0_28] : memref<8x128xf32, #tpu.memory_space<vmem>>, vector<8x128xf32>
      tpu.vector_store %arg6[%c0_27, %c0_28], %38 {strides = array<i32>} : memref<8x128xf32, #tpu.memory_space<vmem>>, vector<8x128xf32>,
      %cst_29 = arith.constant 0.000000e+00 : f32
      %40 = vector.broadcast %cst_29 : f32 to vector<8x128xf32>
      %c0_30 = arith.constant 0 : index
      %c0_31 = arith.constant 0 : index
      %41 = vector.load %arg7[%c0_30, %c0_31] : memref<8x128xf32, #tpu.memory_space<vmem>>, vector<8x128xf32>
      tpu.vector_store %arg7[%c0_30, %c0_31], %40 {strides = array<i32>} : memref<8x128xf32, #tpu.memory_space<vmem>>, vector<8x128xf32>,
    } else {
    }
    %c0 = arith.constant 0 : index
    %c0_1 = arith.constant 0 : index
    %3 = vector.load %arg2[%c0, %c0_1] : memref<16x128xf32, #tpu.memory_space<vmem>>, vector<16x128xf32>
    %c0_2 = arith.constant 0 : index
    %c0_3 = arith.constant 0 : index
    %4 = vector.load %arg3[%c0_2, %c0_3] : memref<16x128xf32, #tpu.memory_space<vmem>>, vector<16x128xf32>
    %5 = math.log %3 : vector<16x128xf32>
    %cst = arith.constant -1.000000e+02 : f32
    %6 = vector.broadcast %cst : f32 to vector<16x128xf32>
    %7 = arith.maximumf %5, %6 : vector<16x128xf32>
    %cst_4 = arith.constant 1.000000e+00 : f32
    %8 = vector.broadcast %cst_4 : f32 to vector<16x128xf32>
    %9 = arith.subf %8, %3 : vector<16x128xf32>
    %10 = math.log %9 : vector<16x128xf32>
    %cst_5 = arith.constant -1.000000e+02 : f32
    %11 = vector.broadcast %cst_5 : f32 to vector<16x128xf32>
    %12 = arith.maximumf %10, %11 : vector<16x128xf32>
    %13 = arith.subf %7, %12 : vector<16x128xf32>
    %14 = arith.mulf %4, %13 : vector<16x128xf32>
    %15 = arith.addf %14, %12 : vector<16x128xf32>
    %c0_6 = arith.constant 0 : index
    %c0_7 = arith.constant 0 : index
    %16 = vector.load %arg5[%c0_6, %c0_7] : memref<8x128xf32, #tpu.memory_space<vmem>>, vector<8x128xf32>
    %17 = arith.mulf %3, %4 : vector<16x128xf32>
    %18 = vector.shape_cast %17 : vector<16x128xf32> to vector<2x8x128xf32>
    %cst_8 = arith.constant dense<0.000000e+00> : vector<8x128xf32>
    %19 = vector.multi_reduction <add>, %18, %cst_8 [0] : vector<2x8x128xf32> to vector<8x128xf32>
    %20 = arith.addf %16, %19 : vector<8x128xf32>
    %c0_9 = arith.constant 0 : index
    %c0_10 = arith.constant 0 : index
    %21 = vector.load %arg5[%c0_9, %c0_10] : memref<8x128xf32, #tpu.memory_space<vmem>>, vector<8x128xf32>
    tpu.vector_store %arg5[%c0_9, %c0_10], %20 {strides = array<i32>} : memref<8x128xf32, #tpu.memory_space<vmem>>, vector<8x128xf32>,
    %c0_11 = arith.constant 0 : index
    %c0_12 = arith.constant 0 : index
    %22 = vector.load %arg6[%c0_11, %c0_12] : memref<8x128xf32, #tpu.memory_space<vmem>>, vector<8x128xf32>
    %23 = arith.addf %3, %4 : vector<16x128xf32>
    %24 = vector.shape_cast %23 : vector<16x128xf32> to vector<2x8x128xf32>
    %cst_13 = arith.constant dense<0.000000e+00> : vector<8x128xf32>
    %25 = vector.multi_reduction <add>, %24, %cst_13 [0] : vector<2x8x128xf32> to vector<8x128xf32>
    %26 = arith.addf %22, %25 : vector<8x128xf32>
    %c0_14 = arith.constant 0 : index
    %c0_15 = arith.constant 0 : index
    %27 = vector.load %arg6[%c0_14, %c0_15] : memref<8x128xf32, #tpu.memory_space<vmem>>, vector<8x128xf32>
    tpu.vector_store %arg6[%c0_14, %c0_15], %26 {strides = array<i32>} : memref<8x128xf32, #tpu.memory_space<vmem>>, vector<8x128xf32>,
    %c0_16 = arith.constant 0 : index
    %c0_17 = arith.constant 0 : index
    %28 = vector.load %arg7[%c0_16, %c0_17] : memref<8x128xf32, #tpu.memory_space<vmem>>, vector<8x128xf32>
    %29 = vector.shape_cast %15 : vector<16x128xf32> to vector<2x8x128xf32>
    %cst_18 = arith.constant dense<0.000000e+00> : vector<8x128xf32>
    %30 = vector.multi_reduction <add>, %29, %cst_18 [0] : vector<2x8x128xf32> to vector<8x128xf32>
    %31 = arith.addf %28, %30 : vector<8x128xf32>
    %c0_19 = arith.constant 0 : index
    %c0_20 = arith.constant 0 : index
    %32 = vector.load %arg7[%c0_19, %c0_20] : memref<8x128xf32, #tpu.memory_space<vmem>>, vector<8x128xf32>
    tpu.vector_store %arg7[%c0_19, %c0_20], %31 {strides = array<i32>} : memref<8x128xf32, #tpu.memory_space<vmem>>, vector<8x128xf32>,
    %c0_i32_21 = arith.constant 0 : i32
    %33 = arith.cmpi eq, %arg1, %c0_i32_21 : i32
    %34 = arith.extui %33 : i1 to i32
    %c0_i32_22 = arith.constant 0 : i32
    %35 = arith.cmpi ne, %34, %c0_i32_22 : i32
    scf.if %35 {
      %c0_23 = arith.constant 0 : index
      %c0_24 = arith.constant 0 : index
      %36 = vector.load %arg5[%c0_23, %c0_24] : memref<8x128xf32, #tpu.memory_space<vmem>>, vector<8x128xf32>
      %37 = vector.shape_cast %36 : vector<8x128xf32> to vector<1x8x128xf32>
      %cst_25 = arith.constant dense<0.000000e+00> : vector<1xf32>
      %38 = vector.multi_reduction <add>, %37, %cst_25 [1, 2] : vector<1x8x128xf32> to vector<1xf32>
      %39 = vector.shape_cast %38 : vector<1xf32> to vector<1x1x1xf32>
      %40 = vector.extract %39[0, 0, 0] : f32 from vector<1x1x1xf32>
      %c0_26 = arith.constant 0 : index
      %c0_27 = arith.constant 0 : index
      %41 = memref.load %arg4[%c0_26, %c0_27] : memref<1x3xf32, #tpu.memory_space<smem>>
      memref.store %40, %arg4[%c0_26, %c0_27] : memref<1x3xf32, #tpu.memory_space<smem>>
      %c0_28 = arith.constant 0 : index
      %c0_29 = arith.constant 0 : index
      %42 = vector.load %arg6[%c0_28, %c0_29] : memref<8x128xf32, #tpu.memory_space<vmem>>, vector<8x128xf32>
      %43 = vector.shape_cast %42 : vector<8x128xf32> to vector<1x8x128xf32>
      %cst_30 = arith.constant dense<0.000000e+00> : vector<1xf32>
      %44 = vector.multi_reduction <add>, %43, %cst_30 [1, 2] : vector<1x8x128xf32> to vector<1xf32>
      %45 = vector.shape_cast %44 : vector<1xf32> to vector<1x1x1xf32>
      %46 = vector.extract %45[0, 0, 0] : f32 from vector<1x1x1xf32>
      %c0_31 = arith.constant 0 : index
      %c1 = arith.constant 1 : index
      %47 = memref.load %arg4[%c0_31, %c1] : memref<1x3xf32, #tpu.memory_space<smem>>
      memref.store %46, %arg4[%c0_31, %c1] : memref<1x3xf32, #tpu.memory_space<smem>>
      %c0_32 = arith.constant 0 : index
      %c0_33 = arith.constant 0 : index
      %48 = vector.load %arg7[%c0_32, %c0_33] : memref<8x128xf32, #tpu.memory_space<vmem>>, vector<8x128xf32>
      %49 = vector.shape_cast %48 : vector<8x128xf32> to vector<1x8x128xf32>
      %cst_34 = arith.constant dense<0.000000e+00> : vector<1xf32>
      %50 = vector.multi_reduction <add>, %49, %cst_34 [1, 2] : vector<1x8x128xf32> to vector<1xf32>
      %51 = vector.shape_cast %50 : vector<1xf32> to vector<1x1x1xf32>
      %52 = vector.extract %51[0, 0, 0] : f32 from vector<1x1x1xf32>
      %cst_35 = arith.constant 0.000000e+00 : f32
      %53 = arith.subf %cst_35, %52 : f32
      %c0_36 = arith.constant 0 : index
      %c2 = arith.constant 2 : index
      %54 = memref.load %arg4[%c0_36, %c2] : memref<1x3xf32, #tpu.memory_space<smem>>
      memref.store %53, %arg4[%c0_36, %c2] : memref<1x3xf32, #tpu.memory_space<smem>>
    } else {
    }
    return
  }
  func.func @transform_0(%arg0: i32, %arg1: i32) -> (i32, i32) {
    %c1_i32 = arith.constant 1 : i32
    %0 = arith.muli %arg0, %c1_i32 : i32
    %1 = arith.addi %0, %arg1 : i32
    %c0_i32 = arith.constant 0 : i32
    %2 = arith.minsi %1, %c0_i32 : i32
    %c0_i32_0 = arith.constant 0 : i32
    %c0_i32_1 = arith.constant 0 : i32
    return %2, %c0_i32_0 : i32, i32
  }
  func.func @transform_1(%arg0: i32, %arg1: i32) -> (i32, i32) {
    %c1_i32 = arith.constant 1 : i32
    %0 = arith.muli %arg0, %c1_i32 : i32
    %1 = arith.addi %0, %arg1 : i32
    %c0_i32 = arith.constant 0 : i32
    %2 = arith.minsi %1, %c0_i32 : i32
    %c0_i32_0 = arith.constant 0 : i32
    %c0_i32_1 = arith.constant 0 : i32
    return %2, %c0_i32_0 : i32, i32
  }
  func.func @transform_2(%arg0: i32, %arg1: i32) -> (i32, i32) {
    %c0_i32 = arith.constant 0 : i32
    %c0_i32_0 = arith.constant 0 : i32
    return %arg0, %c0_i32 : i32, i32
  }
}

</mosaic_0001>

<bundles_post_ra>
// kernel: tpu_custom_call.1
= control target key start
LH: loop header
LB: loop body
LE: loop exit
PB: predicated region body
PF: predicated region fallthrough
CT: control target
= control target key end

     0   :  { %7 = vsyncpa [#allocation6], 0  ;;  %s301_s0 = inlined_call_operand.hbm [shape: f32[16,128], index: 0, kind: input, shape index: {}]   ;;  %s302_s1 = inlined_call_operand.hbm [shape: f32[16,128], index: 1, kind: input, shape index: {}]   ;;  %s303_s2 = inlined_call_operand.hbm [shape: f32[1,3], index: 2, kind: output, shape index: {}]  }
   0x1   :  { %8 = vsyncpa [#allocation9], 0 }
   0x2   :  { %9 = vsyncpa [#allocation7], 0  ;;  %s245_s9 = smov [#allocation5]   ;;  %s185_s13 = scalar_lea.hbm %s301_s0, 256 }
   0x3   :  { %s21_s10 = sshll.u32 %s245_s9, 4  ;;  %p186_p0 = scmp.ne.s32.totalorder %s301_s0, %s185_s13  ;;  %s22_s10 = int_to_ptr.vmem [resolvable:$true] %s21_s10 }
   0x4   :  { %p189_p1 = scmp.lt.u32.totalorder %s185_s13, %s301_s0 }
   0x6   :  { %p191_p2 = pnand %p189_p1, %p186_p0 }
   0x8   :  { %194 = shalt.err (!%p191_p2)
}
   0x9   :  { %s195_s18 = scalar_lea.vmem %s22_s10, 256  ;;  %p200_p4 = scmp.lt.s32.totalorder %s22_s10, %s22_s10 }
   0xa   :  { %p196_p3 = scmp.ne.s32.totalorder %s22_s10, %s195_s18  ;;  %p201_p5 = scmp.lt.s32.totalorder %s195_s18, %s195_s18 }
   0xc   :  { %p202_p6 = por %p201_p5, %p200_p4 }
   0xe   :  { %p203_p7 = pnand %p202_p6, %p196_p3 }
  0x10   :  { %206 = shalt.err (!%p203_p7)
}
  0x11   :  { %s246_s19 = smov 128   ;;  %s247_s20 = smov 8  }
  0x12   :  { %27 = dma.hbm_to_vmem [thread:$0]  %s301_s0, 256, %s22_s10, [#allocation6], %s246_s19, %s246_s19, %s247_s20  }
  0x13   :  { %s248_s23 = smov [#allocation8]   ;;  %s207_s27 = scalar_lea.hbm %s302_s1, 256 }
  0x14   :  { %s39_s24 = sshll.u32 %s248_s23, 4  ;;  %p208_p8 = scmp.ne.s32.totalorder %s302_s1, %s207_s27  ;;  %s40_s24 = int_to_ptr.vmem [resolvable:$true] %s39_s24 }
  0x15   :  { %p211_p9 = scmp.lt.u32.totalorder %s207_s27, %s302_s1 }
  0x17   :  { %p213_p10 = pnand %p211_p9, %p208_p8 }
  0x19   :  { %216 = shalt.err (!%p213_p10)
}
  0x1a   :  { %s217_s4 = scalar_lea.vmem %s40_s24, 256  ;;  %p222_p12 = scmp.lt.s32.totalorder %s40_s24, %s40_s24 }
  0x1b   :  { %p218_p11 = scmp.ne.s32.totalorder %s40_s24, %s217_s4  ;;  %p223_p13 = scmp.lt.s32.totalorder %s217_s4, %s217_s4 }
  0x1d   :  { %p224_p0 = por %p223_p13, %p222_p12 }
  0x1f   :  { %p225_p1 = pnand %p224_p0, %p218_p11 }
  0x21   :  { %228 = shalt.err (!%p225_p1)
}
  0x22   :  { %45 = dma.hbm_to_vmem [thread:$0]  %s302_s1, 256, %s40_s24, [#allocation9], %s246_s19, %s246_s19, %s247_s20  }
  0x23   :  { %239 = dma.done.wait [#allocation6], 256  }
  0x24   :  { %240 = vsyncadd [#allocation6], 4294967040 }
  0x25   :  { %241 = dma.done.wait [#allocation9], 256  }
  0x26   :  { %242 = vsyncadd [#allocation9], 4294967040  ;;  %v67_v0 = vld [vmem:[#allocation5] sm:$0xff]  ;;  %v68_v1 = vld [vmem:[#allocation5 + $0x8] sm:$0xff]  ;;  %s229_s11 = scalar_lea.hbm %s303_s2, 16 }
  0x27   :  { %v69_v2 = vld [vmem:[#allocation8] sm:$0xff]  ;;  %v70_v3 = vld [vmem:[#allocation8 + $0x8] sm:$0xff]  ;;  %177 = vlog2.f32 %v68_v1  ;;  %v77_v6 = vsub.f32 1.0, %v67_v0  ;;  %v78_v9 = vsub.f32 1.0, %v68_v1  ;;  %p230_p2 = scmp.ne.s32.totalorder %s303_s2, %s229_s11  ;;  %p233_p3 = scmp.lt.u32.totalorder %s229_s11, %s303_s2 }
  0x28   :  { %v92_v4 = vmul.f32 %v69_v2, %v67_v0  ;;  %v98_v5 = vadd.f32 %v69_v2, %v67_v0  ;;  %v93_v7 = vmul.f32 %v70_v3, %v68_v1  ;;  %179 = vlog2.f32 %v67_v0 }
  0x29   :  { %v99_v8 = vadd.f32 %v70_v3, %v68_v1  ;;  %181 = vlog2.f32 %v77_v6  ;;  %p235_p4 = pnand %p233_p3, %p230_p2 }
  0x2a   :  { %v94_v10 = vadd.f32 %v93_v7, %v92_v4  ;;  %183 = vlog2.f32 %v78_v9 }
  0x2b   :  { %v100_v11 = vadd.f32 %v99_v8, %v98_v5 }
  0x2c   :  { %111 = vadd.xlane.f32.xlu0 %v94_v10 }
  0x30   :  { %123 = vadd.xlane.f32.xlu0 %v100_v11 }
  0x31   :  { %v178_v12 = vpop.eup %177 }
  0x32   :  { %v180_v13 = vpop.eup %179  ;;  %v74_v14 = vmul.f32 0.6931472, %v178_v12 }
  0x33   :  { %v182_v15 = vpop.eup %181  ;;  %v72_v16 = vmul.f32 0.6931472, %v180_v13 }
  0x34   :  { %v184_v17 = vpop.eup %183  ;;  %v80_v18 = vmul.f32 0.6931472, %v182_v15  ;;  %v76_v20 = vmax.f32 %v74_v14, -100.0 }
  0x35   :  { %v75_v19 = vmax.f32 %v72_v16, -100.0  ;;  %v82_v21 = vmul.f32 0.6931472, %v184_v17 }
  0x36   :  { %v83_v22 = vmax.f32 %v80_v18, -100.0 }
  0x37   :  { %v84_v23 = vmax.f32 %v82_v21, -100.0 }
  0x38   :  { %v85_v24 = vsub.f32 %v75_v19, %v83_v22 }
  0x39   :  { %v86_v25 = vsub.f32 %v76_v20, %v84_v23 }
  0x3a   :  { %v87_v26 = vmul.f32 %v85_v24, %v69_v2 }
  0x3b   :  { %v88_v27 = vmul.f32 %v86_v25, %v70_v3 }
  0x3c   :  { %v89_v28 = vadd.f32 %v87_v26, %v83_v22 }
  0x3d   :  { %v90_v29 = vadd.f32 %v88_v27, %v84_v23 }
  0x3f   :  { %v104_v30 = vadd.f32 %v90_v29, %v89_v28 }
  0x41   :  { %135 = vadd.xlane.f32.xlu1 %v104_v30 }
  0xb9   :  { %v112_v31 = vpop.xlane.xlu0 %111 }
  0xba   :  { %v113_v32 = vrot.slane %v112_v31, 4 }
  0xbc   :  { %v114_v33 = vadd.f32 %v113_v32, %v112_v31 }
  0xbd   :  { %v124_v34 = vpop.xlane.xlu0 %123 }
  0xbe   :  { %v115_v35 = vrot.slane %v114_v33, 2  ;;  %v125_v36 = vrot.slane %v124_v34, 4 }
  0xc0   :  { %v126_v37 = vadd.f32 %v125_v36, %v124_v34  ;;  %v116_v38 = vadd.f32 %v115_v35, %v114_v33 }
  0xc2   :  { %v127_v39 = vrot.slane %v126_v37, 2  ;;  %v117_v40 = vrot.slane %v116_v38, 1 }
  0xc4   :  { %v128_v41 = vadd.f32 %v127_v39, %v126_v37  ;;  %v118_v42 = vadd.f32 %v117_v40, %v116_v38 }
  0xc6   :  { %166 = vpush %v118_v42  ;;  %v129_v43 = vrot.slane %v128_v41, 1 }
  0xc8   :  { %v130_v44 = vadd.f32 %v129_v43, %v128_v41 }
  0xca   :  { %168 = vpush %v130_v44 }
  0xce   :  { %v136_v45 = vpop.xlane.xlu1 %135 }
  0xcf   :  { %v137_v46 = vrot.slane %v136_v45, 4 }
  0xd1   :  { %v138_v47 = vadd.f32 %v137_v46, %v136_v45 }
  0xd3   :  { %v139_v48 = vrot.slane %v138_v47, 2 }
  0xd5   :  { %v140_v49 = vadd.f32 %v139_v48, %v138_v47 }
  0xd7   :  { %v141_v50 = vrot.slane %v140_v49, 1 }
  0xd9   :  { %v142_v51 = vadd.f32 %v141_v50, %v140_v49 }
  0xdb   :  { %170 = vpush %v142_v51 }
  0xf7   :  { %s167_s1 = spop %166 }
  0xf8   :  { %121 = sst [smem:[#allocation10]] %s167_s1 }
  0xfb   :  { %s169_s6 = spop %168 }
  0xfc   :  { %133 = sst [smem:[#allocation10 + $0x1]] %s169_s6 }
 0x10c   :  { %s171_s7 = spop %170 }
 0x10d   :  { %s144_s8 = ssub.f32 0.0, %s171_s7 }
 0x10f   :  { %146 = sst [smem:[#allocation10 + $0x2]] %s144_s8 }
 0x110   :  { %238 = shalt.err (!%p235_p4)
}
 0x111   :  { %s249_s16 = smov [#allocation10]  }
 0x112   :  { %154 = dma.smem_to_hbm %s249_s16, 16, %s303_s2, [#allocation7]  }
 0x113   :  { %243 = dma.done.wait [#allocation7], 16  }
 0x114   :  { %244 = vsyncadd [#allocation7], 4294967280 }
 0x115   :  { %158 = sfence }
 0x116   :  { %159 = vsyncpa [#allocation6], 1 }
 0x117   :  { %160 = vsyncpa [#allocation9], 1 }
 0x118   :  { %161 = vsyncpa [#allocation7], 1 }

</bundles_post_ra>
